<compile_context>
chip_gen: v7x
topology: tpu7x:2x2x1
jax: 0.10.0
libtpu: 0.0.40
codegen_flags: <defaults>
</compile_context>

<pallas_src>
import functools

import jax
import jax.numpy as jnp
from jax.experimental import pallas as pl
from jax.experimental.pallas import tpu as pltpu

LAMBDA_COS = 0.24          # module default
TWO_PI = 2.0 * float(jnp.pi)

LANES = 128                # vreg lane width
SUBLANES = 8               # vreg sublane count
MAX_TILE_ROWS = 2048       # (2048, 128) f32 tile = 1 MiB per input per buffer


def _rotation_loss_kernel(p_ref, t_ref, out_ref, acc_ref, *, inv_n: float):
    # p_ref, t_ref: VMEM (tile_rows, 128) f32
    # out_ref:      SMEM (1, 1) f32 (resident across the grid)
    # acc_ref:      SMEM (1,)   f32 running partial sum
    step = pl.program_id(0)

    @pl.when(step == 0)
    def _init():
        acc_ref[0] = jnp.float32(0.0)

    dist = p_ref[...] - t_ref[...]
    # dist**2 via a VPU multiply; cos is the only transcendental per element.
    loss_elem = dist * dist + LAMBDA_COS * (1.0 - jnp.cos(dist * TWO_PI))
    acc_ref[0] += jnp.sum(loss_elem)

    @pl.when(step == pl.num_programs(0) - 1)
    def _finalize():
        # Multiply by the compile-time constant 1/N (true N, not padded N).
        out_ref[0, 0] = acc_ref[0] * jnp.float32(inv_n)


def rotation_loss(predict: jax.Array, target: jax.Array) -> jax.Array:
    """predict, target: float32 [N] in [0, 1). Returns scalar float32 loss."""
    assert predict.shape == target.shape
    assert predict.ndim == 1
    n = predict.shape[0]

    # Lane/sublane-dense slab: (rows, 128) with rows a multiple of 8 and of the
    # tile height so the grid divides evenly.
    rows = pl.cdiv(n, LANES)
    rows = ((rows + SUBLANES - 1) // SUBLANES) * SUBLANES
    tile_rows = min(MAX_TILE_ROWS, rows)
    rows = ((rows + tile_rows - 1) // tile_rows) * tile_rows
    n_pad = rows * LANES
    grid_steps = rows // tile_rows

    p2d = jnp.pad(predict.astype(jnp.float32), (0, n_pad - n)).reshape(rows, LANES)
    t2d = jnp.pad(target.astype(jnp.float32), (0, n_pad - n)).reshape(rows, LANES)

    kernel = functools.partial(_rotation_loss_kernel, inv_n=1.0 / n)

    out = pl.pallas_call(
        kernel,
        out_shape=jax.ShapeDtypeStruct((1, 1), jnp.float32),
        grid=(grid_steps,),
        in_specs=[
            pl.BlockSpec((tile_rows, LANES), lambda i: (i, 0)),
            pl.BlockSpec((tile_rows, LANES), lambda i: (i, 0)),
        ],
        out_specs=pl.BlockSpec(memory_space=pltpu.MemorySpace.SMEM),
        scratch_shapes=[pltpu.SMEM((1,), jnp.float32)],
        compiler_params=pltpu.CompilerParams(
            dimension_semantics=("arbitrary",),  # reduction axis
        ),
    )(p2d, t2d)
    return out[0, 0]


def rotation_loss_ref(predict: jax.Array, target: jax.Array) -> jax.Array:
    """Pure-JAX reference for correctness checking."""
    dist = predict - target
    return jnp.mean(dist * dist + LAMBDA_COS * (1.0 - jnp.cos(dist * TWO_PI)))


if __name__ == "__main__":
    key = jax.random.PRNGKey(0)
    k1, k2 = jax.random.split(key)

    # Spec-sized case: batch of 8 angle fractions in [0, 1).
    batch = 8
    predict = jax.random.uniform(k1, (batch,), dtype=jnp.float32)
    target = jax.random.uniform(k2, (batch,), dtype=jnp.float32)

    loss = rotation_loss(predict, target)
    jax.block_until_ready(loss)
    ref = rotation_loss_ref(predict, target)
    assert jnp.allclose(loss, ref, atol=1e-5, rtol=1e-5), (loss, ref)

    # Non-aligned larger case: exercises the zero-pad path and the multi-step
    # accumulating reduction grid (grid_steps > 1).
    k3, k4 = jax.random.split(k2)
    n_big = 300_000
    p_big = jax.random.uniform(k3, (n_big,), dtype=jnp.float32)
    t_big = jax.random.uniform(k4, (n_big,), dtype=jnp.float32)

    loss_big = rotation_loss(p_big, t_big)
    jax.block_until_ready(loss_big)
    ref_big = rotation_loss_ref(p_big, t_big)
    assert jnp.allclose(loss_big, ref_big, atol=1e-5, rtol=1e-4), (loss_big, ref_big)

    print("KERNEL_OK")
</pallas_src>

<mosaic_0001>
module attributes {stable_mosaic.version = 11 : i64} {
  func.func @_rotation_loss_kernel(%arg0: i32, %arg1: memref<8x128xf32, #tpu.memory_space<vmem>>, %arg2: memref<8x128xf32, #tpu.memory_space<vmem>>, %arg3: memref<1x1xf32, #tpu.memory_space<smem>>, %arg4: memref<1xf32, #tpu.memory_space<smem>>) attributes {dimension_semantics = [#tpu.dimension_semantics<arbitrary>], iteration_bounds = array<i64: 1>, scalar_prefetch = 0 : i64, scratch_operands = 1 : i64, tpu.core_type = #tpu.core_type<tc>, window_params = [{transform_indices = @transform_0, window_bounds = array<i64: 8, 128>}, {transform_indices = @transform_1, window_bounds = array<i64: 8, 128>}, {transform_indices = @transform_2, window_bounds = array<i64: 1, 1>}]} {
    %c0_i32 = arith.constant 0 : i32
    %0 = arith.cmpi eq, %arg0, %c0_i32 : i32
    %1 = arith.extui %0 : i1 to i32
    %c0_i32_0 = arith.constant 0 : i32
    %2 = arith.cmpi ne, %1, %c0_i32_0 : i32
    scf.if %2 {
      %cst_11 = arith.constant 0.000000e+00 : f32
      %c0_12 = arith.constant 0 : index
      %25 = memref.load %arg4[%c0_12] : memref<1xf32, #tpu.memory_space<smem>>
      memref.store %cst_11, %arg4[%c0_12] : memref<1xf32, #tpu.memory_space<smem>>
    } else {
    }
    %c0 = arith.constant 0 : index
    %c0_1 = arith.constant 0 : index
    %3 = vector.load %arg1[%c0, %c0_1] : memref<8x128xf32, #tpu.memory_space<vmem>>, vector<8x128xf32>
    %c0_2 = arith.constant 0 : index
    %c0_3 = arith.constant 0 : index
    %4 = vector.load %arg2[%c0_2, %c0_3] : memref<8x128xf32, #tpu.memory_space<vmem>>, vector<8x128xf32>
    %5 = arith.subf %3, %4 : vector<8x128xf32>
    %6 = arith.mulf %5, %5 : vector<8x128xf32>
    %cst = arith.constant 6.28318548 : f32
    %7 = vector.broadcast %cst : f32 to vector<8x128xf32>
    %8 = arith.mulf %5, %7 : vector<8x128xf32>
    %9 = math.cos %8 : vector<8x128xf32>
    %cst_4 = arith.constant 1.000000e+00 : f32
    %10 = vector.broadcast %cst_4 : f32 to vector<8x128xf32>
    %11 = arith.subf %10, %9 : vector<8x128xf32>
    %cst_5 = arith.constant 2.400000e-01 : f32
    %12 = vector.broadcast %cst_5 : f32 to vector<8x128xf32>
    %13 = arith.mulf %12, %11 : vector<8x128xf32>
    %14 = arith.addf %6, %13 : vector<8x128xf32>
    %c0_6 = arith.constant 0 : index
    %15 = memref.load %arg4[%c0_6] : memref<1xf32, #tpu.memory_space<smem>>
    %16 = vector.shape_cast %14 : vector<8x128xf32> to vector<1x8x128xf32>
    %cst_7 = arith.constant dense<0.000000e+00> : vector<1xf32>
    %17 = vector.multi_reduction <add>, %16, %cst_7 [1, 2] : vector<1x8x128xf32> to vector<1xf32>
    %18 = vector.shape_cast %17 : vector<1xf32> to vector<1x1x1xf32>
    %19 = vector.extract %18[0, 0, 0] : f32 from vector<1x1x1xf32>
    %20 = arith.addf %15, %19 : f32
    %c0_8 = arith.constant 0 : index
    %21 = memref.load %arg4[%c0_8] : memref<1xf32, #tpu.memory_space<smem>>
    memref.store %20, %arg4[%c0_8] : memref<1xf32, #tpu.memory_space<smem>>
    %c0_i32_9 = arith.constant 0 : i32
    %22 = arith.cmpi eq, %arg0, %c0_i32_9 : i32
    %23 = arith.extui %22 : i1 to i32
    %c0_i32_10 = arith.constant 0 : i32
    %24 = arith.cmpi ne, %23, %c0_i32_10 : i32
    scf.if %24 {
      %c0_11 = arith.constant 0 : index
      %25 = memref.load %arg4[%c0_11] : memref<1xf32, #tpu.memory_space<smem>>
      %cst_12 = arith.constant 1.250000e-01 : f32
      %26 = arith.mulf %25, %cst_12 : f32
      %c0_13 = arith.constant 0 : index
      %c0_14 = arith.constant 0 : index
      %27 = memref.load %arg3[%c0_13, %c0_14] : memref<1x1xf32, #tpu.memory_space<smem>>
      memref.store %26, %arg3[%c0_13, %c0_14] : memref<1x1xf32, #tpu.memory_space<smem>>
    } else {
    }
    return
  }
  func.func @transform_0(%arg0: i32) -> (i32, i32) {
    %c0_i32 = arith.constant 0 : i32
    %c0_i32_0 = arith.constant 0 : i32
    return %arg0, %c0_i32 : i32, i32
  }
  func.func @transform_1(%arg0: i32) -> (i32, i32) {
    %c0_i32 = arith.constant 0 : i32
    %c0_i32_0 = arith.constant 0 : i32
    return %arg0, %c0_i32 : i32, i32
  }
  func.func @transform_2(%arg0: i32) -> (i32, i32) {
    %c0_i32 = arith.constant 0 : i32
    %c0_i32_0 = arith.constant 0 : i32
    %c0_i32_1 = arith.constant 0 : i32
    return %c0_i32, %c0_i32_0 : i32, i32
  }
}

</mosaic_0001>

<bundles_post_ra>
// kernel: tpu_custom_call.1
= control target key start
LH: loop header
LB: loop body
LE: loop exit
PB: predicated region body
PF: predicated region fallthrough
CT: control target
= control target key end

     0   :  { %7 = vsyncpa [#allocation4], 0  ;;  %s357_s0 = inlined_call_operand.hbm [shape: f32[8,128], index: 0, kind: input, shape index: {}]   ;;  %s358_s1 = inlined_call_operand.hbm [shape: f32[8,128], index: 1, kind: input, shape index: {}]   ;;  %s359_s2 = inlined_call_operand.hbm [shape: f32[1,1], index: 2, kind: output, shape index: {}]  }
   0x1   :  { %8 = vsyncpa [#allocation7], 0 }
   0x2   :  { %9 = vsyncpa [#allocation5], 0  ;;  %s271_s9 = smov [#allocation3]   ;;  %s272_s11 = smov [#allocation6]  }
   0x3   :  { %s16_s10 = sshll.u32 %s271_s9, 4  ;;  %s26_s12 = sshll.u32 %s272_s11, 4  ;;  %s17_s10 = int_to_ptr.vmem [resolvable:$true] %s16_s10  ;;  %s27_s12 = int_to_ptr.vmem [resolvable:$true] %s26_s12 }
   0x4   :  { %s211_s15 = scalar_lea.hbm %s357_s0, 128 }
   0x5   :  { %p212_p0 = scmp.ne.s32.totalorder %s357_s0, %s211_s15  ;;  %p215_p1 = scmp.lt.u32.totalorder %s211_s15, %s357_s0 }
   0x7   :  { %p217_p2 = pnand %p215_p1, %p212_p0 }
   0x9   :  { %220 = shalt.err (!%p217_p2)
}
   0xa   :  { %s221_s20 = scalar_lea.vmem %s17_s10, 128  ;;  %p226_p4 = scmp.lt.s32.totalorder %s17_s10, %s17_s10 }
   0xb   :  { %p222_p3 = scmp.ne.s32.totalorder %s17_s10, %s221_s20  ;;  %p227_p5 = scmp.lt.s32.totalorder %s221_s20, %s221_s20 }
   0xd   :  { %p228_p6 = por %p227_p5, %p226_p4 }
   0xf   :  { %p229_p7 = pnand %p228_p6, %p222_p3 }
  0x11   :  { %232 = shalt.err (!%p229_p7)
}
  0x12   :  { %19 = dma.hbm_to_vmem [thread:$0]  %s357_s0, 128, %s17_s10, [#allocation4]  }
  0x13   :  { %s233_s25 = scalar_lea.hbm %s358_s1, 128 }
  0x14   :  { %p234_p8 = scmp.ne.s32.totalorder %s358_s1, %s233_s25  ;;  %p237_p9 = scmp.lt.u32.totalorder %s233_s25, %s358_s1 }
  0x16   :  { %p239_p10 = pnand %p237_p9, %p234_p8 }
  0x18   :  { %242 = shalt.err (!%p239_p10)
}
  0x19   :  { %s243_s30 = scalar_lea.vmem %s27_s12, 128  ;;  %p248_p12 = scmp.lt.s32.totalorder %s27_s12, %s27_s12 }
  0x1a   :  { %p244_p11 = scmp.ne.s32.totalorder %s27_s12, %s243_s30  ;;  %p249_p13 = scmp.lt.s32.totalorder %s243_s30, %s243_s30 }
  0x1c   :  { %p250_p0 = por %p249_p13, %p248_p12 }
  0x1e   :  { %p251_p1 = pnand %p250_p0, %p244_p11 }
  0x20   :  { %254 = shalt.err (!%p251_p1)
}
  0x21   :  { %29 = dma.hbm_to_vmem [thread:$0]  %s358_s1, 128, %s27_s12, [#allocation7]  }
  0x22   :  { %265 = dma.done.wait [#allocation4], 128  }
  0x23   :  { %266 = vsyncadd [#allocation4], 4294967168 }
  0x24   :  { %267 = dma.done.wait [#allocation7], 128  }
  0x25   :  { %268 = vsyncadd [#allocation7], 4294967168  ;;  %v42_v0 = vld [vmem:[#allocation3] sm:$0xff]  ;;  %v43_v1 = vld [vmem:[#allocation6] sm:$0xff]  ;;  %v273_v15 = vmov 683565275  }
  0x26   :  { %v319_v2 = vsub.f32 %v42_v0, %v43_v1  ;;  %v274_v17 = vmov 2475754826   ;;  %v275_v19 = vmov 2131351028   ;;  %v276_v21 = vmov 2102212464  }
  0x27   :  { %v277_v23 = vmov 920167782   ;;  %v278_v30 = vmov 1326507024   ;;  %s255_s7 = scalar_lea.hbm %s359_s2, 16 }
  0x28   :  { %v322_v3 = vmul.f32 6.2831855, %v319_v2  ;;  %p256_p2 = scmp.ne.s32.totalorder %s359_s2, %s255_s7  ;;  %p259_p3 = scmp.lt.u32.totalorder %s255_s7, %s359_s2 }
  0x2a   :  { %v50_v4 = vand.u32 2139095040, %v322_v3  ;;  %v47_v6 = vand.u32 2147483647, %v322_v3  ;;  %vm49_vm7 = vcmp.lt.s32.totalorder %v322_v3, 0  ;;  %vm139_vm12 = vweird.f32 %v322_v3  ;;  %p261_p4 = pnand %p259_p3, %p256_p2 }
  0x2c   :  { %v51_v5 = vshrl.u32 %v50_v4, 23  ;;  %v54_v9 = vand.u32 8388607, %v47_v6  ;;  %vm48_vm8 = vcmp.le.f32.partialorder %v47_v6, 0.7853982 }
  0x2e   :  { %v188_v7 = vadd.s32 4294967169, %v51_v5  ;;  %v55_v12 = vor.u32 8388608, %v54_v9 }
  0x30   :  { %v57_v8 = vadd.s32 1, %v188_v7  ;;  %v95_v32 = vshll.u32 %v55_v12, 8 }
  0x32   :  { %vm58_vm0 = vcmp.gt.s32.totalorder %v57_v8, 0 }
  0x33   :  { %v59_v10 = vsel %vm58_vm0, %v57_v8, 0 }
  0x34   :  { %v61_v11 = vand.u32 31, %v59_v10  ;;  %v60_v13 = vshrl.u32 %v59_v10, 5 }
  0x36   :  { %v62_v14 = vsub.s32 32, %v61_v11  ;;  %v64_v16 = vshll.u32 %v273_v15, %v61_v11  ;;  %v67_v18 = vshll.u32 %v274_v17, %v61_v11  ;;  %v70_v20 = vshll.u32 %v275_v19, %v61_v11 }
  0x37   :  { %v73_v22 = vshll.u32 %v276_v21, %v61_v11  ;;  %v76_v24 = vshll.u32 %v277_v23, %v61_v11  ;;  %vm79_vm1 = vcmp.lt.s32.totalorder %v60_v13, 1  ;;  %vm82_vm2 = vcmp.lt.s32.totalorder %v60_v13, 4 }
  0x38   :  { %v63_v25 = vshrl.u32 %v273_v15, %v62_v14  ;;  %v65_v26 = vshrl.u32 %v274_v17, %v62_v14  ;;  %v68_v27 = vshrl.u32 %v275_v19, %v62_v14  ;;  %v71_v28 = vshrl.u32 %v276_v21, %v62_v14 }
  0x39   :  { %v74_v29 = vshrl.u32 %v277_v23, %v62_v14  ;;  %v77_v31 = vshrl.u32 %v278_v30, %v62_v14  ;;  %vm80_vm3 = vcmp.lt.s32.totalorder %v60_v13, 2  ;;  %vm81_vm4 = vcmp.lt.s32.totalorder %v60_v13, 3 }
  0x3a   :  { %v66_v33 = vor.u32 %v65_v26, %v64_v16  ;;  %v69_v34 = vor.u32 %v68_v27, %v67_v18  ;;  %v72_v35 = vor.u32 %v71_v28, %v70_v20 }
  0x3b   :  { %v75_v36 = vor.u32 %v74_v29, %v73_v22  ;;  %v78_v37 = vor.u32 %v77_v31, %v76_v24 }
  0x3c   :  { %v83_v38 = vsel %vm79_vm1, %v63_v25, %v66_v33  ;;  %v84_v39 = vsel %vm82_vm2, %v72_v35, 2102212464  ;;  %v87_v40 = vsel %vm79_vm1, %v66_v33, %v69_v34  ;;  %v91_v41 = vsel %vm79_vm1, %v69_v34, %v72_v35 }
  0x3d   :  { %v85_v42 = vsel %vm81_vm4, %v69_v34, %v84_v39  ;;  %v88_v43 = vsel %vm82_vm2, %v75_v36, 920167782  ;;  %v92_v44 = vsel %vm82_vm2, %v78_v37, 1326507024 }
  0x3e   :  { %v89_v45 = vsel %vm81_vm4, %v72_v35, %v88_v43  ;;  %v93_v46 = vsel %vm81_vm4, %v75_v36, %v92_v44  ;;  %v86_v47 = vsel %vm80_vm3, %v83_v38, %v85_v42 }
  0x3f   :  { %v90_v48 = vsel %vm80_vm3, %v87_v40, %v89_v45  ;;  %v94_v49 = vsel %vm80_vm3, %v91_v41, %v93_v46  ;;  %v102_v54 = vmul.u32 %v95_v32, %v86_v47 }
  0x40   :  { %v328_v50 = vmul.u32.u64.low %v95_v32, %v94_v49  ;;  %v329_v51 = vmul.u32.u64.high %v95_v32, %v94_v49, %v328_v50  ;;  %v331_v52 = vmul.u32.u64.low %v95_v32, %v90_v48  ;;  %v332_v53 = vmul.u32.u64.high %v95_v32, %v90_v48, %v331_v52 }
  0x41   :  { %v45_v32 = vmul.f32 %v319_v2, %v319_v2 }
  0x42   :  { %vm104_vm5 = vc.u32 %v329_v51, %v331_v52  ;;  %v105_v55 = vadd.s32 1, %v332_v53  ;;  %v103_v4 = vadd.s32 %v331_v52, %v329_v51 }
  0x44   :  { %v106_v56 = vsel %vm104_vm5, %v105_v55, %v332_v53 }
  0x45   :  { %v107_v57 = vadd.s32 %v106_v56, %v102_v54 }
  0x47   :  { %v108_v58 = vadd.s32 536870912, %v107_v57 }
  0x49   :  { %v109_v59 = vshrl.u32 %v108_v58, 30 }
  0x4b   :  { %v110_v60 = vshll.u32 %v109_v59, 30  ;;  %v133_v19 = vsub.s32 4, %v109_v59 }
  0x4d   :  { %v111_v61 = vsub.s32 %v107_v57, %v110_v60  ;;  %v134_v22 = vsel %vm49_vm7, %v133_v19, %v109_v59 }
  0x4e   :  { %v136_v23 = vsel %vm48_vm8, 0, %v134_v22 }
  0x4f   :  { %v113_v62 = vsub.s32 0, %v111_v61  ;;  %v140_v24 = vand.u32 3, %v136_v23 }
  0x51   :  { %v189_v63 = vmin.u32 %v113_v62, %v111_v61  ;;  %vm145_vm9 = vcmp.eq.s32.totalorder %v140_v24, 2  ;;  %vm142_vm10 = vcmp.eq.s32.totalorder %v140_v24, 0  ;;  %vm141_vm11 = vcmp.lt.s32.totalorder %v140_v24, 2 }
  0x53   :  { %v115_v0 = vclz %v189_v63 }
  0x55   :  { %v190_v1 = vadd.s32 4294967294, %v115_v0 }
  0x57   :  { %vm191_vm6 = vcmp.lt.s32.totalorder %v190_v1, 0 }
  0x58   :  { %v118_v5 = vsel %vm191_vm6, 0, %v190_v1 }
  0x59   :  { %v119_v7 = vsub.s32 32, %v118_v5  ;;  %v120_v8 = vshll.u32 %v111_v61, %v118_v5  ;;  %v123_v9 = vsub.s32 4294967266, %v118_v5 }
  0x5b   :  { %v121_v10 = vshrl.u32 %v103_v4, %v119_v7  ;;  %v124_v11 = vadd.s32 127, %v123_v9 }
  0x5d   :  { %v122_v12 = vor.u32 %v121_v10, %v120_v8  ;;  %v125_v13 = vshll.u32 %v124_v11, 23 }
  0x5f   :  { %v126_v14 = vor.u32 4788187, %v125_v13  ;;  %v129_v15 = vcvt.s32.f32 %v122_v12 }
  0x61   :  { %v127_v16 = vand.u32 2147483647, %v126_v14 }
  0x63   :  { %v130_v17 = vmul.f32 %v129_v15, %v127_v16 }
  0x65   :  { %v131_v18 = vxor.u32 2147483648, %v130_v17 }
  0x67   :  { %v132_v20 = vsel %vm49_vm7, %v131_v18, %v130_v17 }
  0x68   :  { %v135_v21 = vsel %vm48_vm8, %v322_v3, %v132_v20 }
  0x69   :  { %207 = vcosq.f32 %v135_v21 }
  0x6a   :  { %209 = vsinq.f32 %v135_v21 }
  0x73   :  { %v208_v25 = vpop.eup %207 }
  0x74   :  { %v210_v26 = vpop.eup %209  ;;  %v146_v27 = vxor.u32 2147483648, %v208_v25 }
  0x75   :  { %v143_v28 = vxor.u32 2147483648, %v210_v26 }
  0x76   :  { %v147_v6 = vsel %vm145_vm9, %v146_v27, %v210_v26 }
  0x77   :  { %v144_v29 = vsel %vm142_vm10, %v208_v25, %v143_v28 }
  0x78   :  { %v148_v30 = vsel %vm141_vm11, %v144_v29, %v147_v6 }
  0x79   :  { %v149_v31 = vsel %vm139_vm12, nan, %v148_v30 }
  0x7a   :  { %v150_v33 = vsub.f32 1.0, %v149_v31 }
  0x7c   :  { %v151_v34 = vmul.f32 0.24, %v150_v33 }
  0x7e   :  { %v152_v35 = vadd.f32 %v151_v34, %v45_v32 }
  0x80   :  { %154 = vadd.xlane.f32.xlu0 %v152_v35 }
 0x10d   :  { %v155_v36 = vpop.xlane.xlu0 %154 }
 0x10e   :  { %v156_v37 = vrot.slane %v155_v36, 4 }
 0x110   :  { %v157_v38 = vadd.f32 %v156_v37, %v155_v36 }
 0x112   :  { %v158_v39 = vrot.slane %v157_v38, 2 }
 0x114   :  { %v159_v40 = vadd.f32 %v158_v39, %v157_v38 }
 0x116   :  { %v160_v41 = vrot.slane %v159_v40, 1 }
 0x118   :  { %v161_v42 = vadd.f32 %v160_v41, %v159_v40 }
 0x11a   :  { %196 = vpush %v161_v42 }
 0x14b   :  { %s197_s1 = spop %196 }
 0x14c   :  { %s170_s4 = smul.f32 0.125, %s197_s1 }
 0x14e   :  { %172 = sst [smem:[#allocation8]] %s170_s4 }
 0x14f   :  { %264 = shalt.err (!%p261_p4)
}
 0x150   :  { %s279_s12 = smov [#allocation8]  }
 0x151   :  { %180 = dma.smem_to_hbm %s279_s12, 16, %s359_s2, [#allocation5]  }
 0x152   :  { %269 = dma.done.wait [#allocation5], 16  }
 0x153   :  { %270 = vsyncadd [#allocation5], 4294967280 }
 0x154   :  { %184 = sfence }
 0x155   :  { %185 = vsyncpa [#allocation4], 1 }
 0x156   :  { %186 = vsyncpa [#allocation7], 1 }
 0x157   :  { %187 = vsyncpa [#allocation5], 1 }

</bundles_post_ra>
